<compile_context>
chip_gen: v5e
topology: v5e:2x2
jax: 0.10.0
libtpu: 0.0.40
codegen_flags: <defaults>
</compile_context>

<pallas_src>
import math
import functools

import jax
import jax.numpy as jnp
from jax.experimental import pallas as pl
from jax.experimental.pallas import tpu as pltpu


def _round_up(x, m):
    return ((x + m - 1) // m) * m


# ---------------------------------------------------------------------------
# Kernel: fused actor|critic MLP + diag-covariance MVN log-prob
# ---------------------------------------------------------------------------
def _actor_critic_kernel(
    sa_ref, rstd_ref, const_ref,
    w1_ref, b1_ref, w2_ref, b2_ref, w3_ref, b3_ref, w4_ref, b4_ref,
    out_ref,
    *, state_dim, action_dim, tanh_bf16,
):
    f32 = jnp.float32
    bf16 = jnp.bfloat16

    sa = sa_ref[...]                                    # [TB, S+A] f32
    x = sa[:, :state_dim]                               # [TB, S]
    a = sa[:, state_dim:state_dim + action_dim]         # [TB, A]
    rstd = rstd_ref[...]                                # [1, A]  f32 = 1/sqrt(var)
    logp_const = const_ref[0]                           # scalar  f32

    def act(z):
        # bias-add -> tanh -> bf16 as ONE expression (no separate f32 copy).
        # bf16 tanh on v6e/v7x (bf16 EUP); f32 tanh on v5e/older.
        if tanh_bf16:
            return jnp.tanh(z.astype(bf16))
        return jnp.tanh(z).astype(bf16)

    # fused actor||critic MLP: bf16 MXU operands, f32 accumulation
    h = act(jnp.dot(x.astype(bf16), w1_ref[...], preferred_element_type=f32)
            + b1_ref[...])                              # [TB, 256] bf16
    h = act(jnp.dot(h, w2_ref[...], preferred_element_type=f32) + b2_ref[...])
    h = act(jnp.dot(h, w3_ref[...], preferred_element_type=f32) + b3_ref[...])
    o = jnp.dot(h, w4_ref[...], preferred_element_type=f32) + b4_ref[...]
                                                        # [TB, A+1] (mean | value)

    head = o[:, :action_dim]
    if tanh_bf16:
        mean = jnp.tanh(head.astype(bf16)).astype(f32)  # actor head Tanh
    else:
        mean = jnp.tanh(head)
    value = o[:, action_dim:action_dim + 1]             # critic head is linear

    # MultivariateNormal(mean, diag(var)) log_prob (constants hoisted)
    d = (a - mean) * rstd
    maha = jnp.sum(d * d, axis=-1, keepdims=True)       # [TB, 1]
    logp = logp_const - 0.5 * maha

    # single full-block store (logp | value)
    out_ref[...] = jnp.concatenate([logp, value], axis=-1)


# ---------------------------------------------------------------------------
# Parameters
# ---------------------------------------------------------------------------
def init_params(key, state_dim, action_dim):
    """Deterministic PyTorch-style init; weights stored [in, out] (x @ W + b)."""
    dims_actor = [state_dim, 128, 64, 32, action_dim]
    dims_critic = [state_dim, 128, 64, 32, 1]
    params = []
    for dims in (dims_actor, dims_critic):
        for fan_in, fan_out in zip(dims[:-1], dims[1:]):
            key, kw, kb = jax.random.split(key, 3)
            bound = 1.0 / math.sqrt(fan_in)
            w = jax.random.uniform(kw, (fan_in, fan_out), jnp.float32, -bound, bound)
            b = jax.random.uniform(kb, (1, fan_out), jnp.float32, -bound, bound)
            params += [w, b]
    return params  # 16 arrays: actor (w,b)x4 then critic (w,b)x4


def pack_params(params):
    """Fuse actor/critic weights (concat layer 1, block-diag layers 2-4), bf16."""
    (aw1, ab1, aw2, ab2, aw3, ab3, aw4, ab4,
     cw1, cb1, cw2, cb2, cw3, cb3, cw4, cb4) = params

    def blockdiag(wa, wc):
        top = jnp.concatenate([wa, jnp.zeros((wa.shape[0], wc.shape[1]), wa.dtype)], 1)
        bot = jnp.concatenate([jnp.zeros((wc.shape[0], wa.shape[1]), wc.dtype), wc], 1)
        return jnp.concatenate([top, bot], 0)

    bf16 = jnp.bfloat16
    w1 = jnp.concatenate([aw1, cw1], axis=1).astype(bf16)    # [S, 256]
    b1 = jnp.concatenate([ab1, cb1], axis=1)                 # [1, 256] f32
    w2 = blockdiag(aw2, cw2).astype(bf16)                    # [256, 128]
    b2 = jnp.concatenate([ab2, cb2], axis=1)                 # [1, 128]
    w3 = blockdiag(aw3, cw3).astype(bf16)                    # [128, 64]
    b3 = jnp.concatenate([ab3, cb3], axis=1)                 # [1, 64]
    w4 = blockdiag(aw4, cw4).astype(bf16)                    # [64, A+1]
    b4 = jnp.concatenate([ab4, cb4], axis=1)                 # [1, A+1]
    return (w1, b1, w2, b2, w3, b3, w4, b4)


# ---------------------------------------------------------------------------
# Generation-aware configuration (trace-time Python)
# ---------------------------------------------------------------------------
def _chip_kind():
    return jax.devices()[0].device_kind.lower()


def _tanh_bf16_default():
    kind = _chip_kind()
    return ("v6" in kind) or ("v7" in kind)   # bf16 EUP/VPU only on v6e/v7x


def _pick_tile_b(B, tile_b):
    kind = _chip_kind()
    if tile_b is not None:
        return min(tile_b, _round_up(B, 8))
    if "v5" in kind:
        cap = 1024                 # 16 MiB default scoped VMEM, 1 vst slot
    elif "v7" in kind:
        cap = 2048                 # 64 MiB physical VMEM per TC
    else:                          # v6e (128 MiB VMEM) and unknown/newer
        cap = 4096
    tb = min(cap, _round_up(B, 8))
    if "v7" in kind and B > 16:
        # 2 TCs/chip: keep >= 2 grid steps so the "parallel" axis can shard.
        tb = min(tb, _round_up(pl.cdiv(B, 2), 8))
    return tb


def _vmem_limit_bytes():
    kind = _chip_kind()
    if "v7" in kind:
        return 48 << 20
    if "v6" in kind:
        return 96 << 20
    if "v5" in kind:
        return 64 << 20
    return None


# ---------------------------------------------------------------------------
# Wrapper
# ---------------------------------------------------------------------------
@functools.partial(jax.jit, static_argnames=("tile_b",))
def evaluate(state, action, action_var, packed, *, tile_b=None):
    B, S = state.shape
    A = action.shape[-1]
    w1, b1, w2, b2, w3, b3, w4, b4 = packed
    tanh_bf16 = _tanh_bf16_default()

    # Distribution constants depend only on action_var -> hoisted out of kernel.
    var = action_var.reshape(-1).astype(jnp.float32)             # [A], var > 0
    rstd = (1.0 / jnp.sqrt(var)).reshape(1, A)
    log_det = jnp.sum(jnp.log(var))
    log2pi = math.log(2.0 * math.pi)
    logp_const = (-0.5 * (A * log2pi + log_det)).reshape(1).astype(jnp.float32)
    entropy = 0.5 * A * (1.0 + log2pi) + 0.5 * log_det           # batch-independent

    # Batch tiling (multiple of 8 sublanes, padded to a tile multiple).
    tb = _pick_tile_b(B, tile_b)
    b_pad = _round_up(B, tb)

    # Merge the two narrow inputs into one lane-padded stream.
    sa = jnp.concatenate([state, action], axis=-1).astype(jnp.float32)  # [B, S+A]
    if b_pad != B:
        sa = jnp.pad(sa, ((0, b_pad - B), (0, 0)))
    grid = (b_pad // tb,)

    def resident(shape):  # whole-array block, constant index -> DMA'd once
        return pl.BlockSpec(shape, lambda i: (0, 0))

    out = pl.pallas_call(
        functools.partial(_actor_critic_kernel, state_dim=S, action_dim=A,
                          tanh_bf16=tanh_bf16),
        out_shape=jax.ShapeDtypeStruct((b_pad, 2), jnp.float32),
        grid=grid,
        in_specs=[
            pl.BlockSpec((tb, S + A), lambda i: (i, 0)),          # state||action
            resident((1, A)),                                     # rstd
            pl.BlockSpec(memory_space=pltpu.MemorySpace.SMEM),    # logp constant
            resident(w1.shape), resident(b1.shape),
            resident(w2.shape), resident(b2.shape),
            resident(w3.shape), resident(b3.shape),
            resident(w4.shape), resident(b4.shape),
        ],
        out_specs=pl.BlockSpec((tb, 2), lambda i: (i, 0)),
        compiler_params=pltpu.CompilerParams(
            dimension_semantics=("parallel",),
            vmem_limit_bytes=_vmem_limit_bytes()),
    )(sa, rstd, logp_const, w1, b1, w2, b2, w3, b3, w4, b4)

    logp = out[:B, 0]
    # TODO(synk): torch.squeeze(state_value) would return a 0-d tensor for B==1;
    # here value always has shape (B,).
    value = out[:B, 1]
    ent = jnp.full((B,), entropy, jnp.float32)
    return logp, value, ent


# ---------------------------------------------------------------------------
# Pure-JAX reference (unpacked weights; mirrors the kernel's dtype choices)
# ---------------------------------------------------------------------------
def evaluate_ref(state, action, action_var, params, *, tanh_bf16):
    (aw1, ab1, aw2, ab2, aw3, ab3, aw4, ab4,
     cw1, cb1, cw2, cb2, cw3, cb3, cw4, cb4) = params
    bf16, f32 = jnp.bfloat16, jnp.float32

    def dot_bf16(x, w):
        return jnp.dot(x.astype(bf16), w.astype(bf16), preferred_element_type=f32)

    def act_fn(z):
        return jnp.tanh(z.astype(bf16)).astype(f32) if tanh_bf16 else jnp.tanh(z)

    h = act_fn(dot_bf16(state, aw1) + ab1)
    h = act_fn(dot_bf16(h, aw2) + ab2)
    h = act_fn(dot_bf16(h, aw3) + ab3)
    mean_pre = dot_bf16(h, aw4) + ab4
    mean = jnp.tanh(mean_pre.astype(bf16)).astype(f32) if tanh_bf16 else jnp.tanh(mean_pre)

    c = act_fn(dot_bf16(state, cw1) + cb1)
    c = act_fn(dot_bf16(c, cw2) + cb2)
    c = act_fn(dot_bf16(c, cw3) + cb3)
    value = dot_bf16(c, cw4) + cb4

    var = action_var.reshape(-1).astype(f32)
    rstd = 1.0 / jnp.sqrt(var)
    k = mean.shape[-1]
    log2pi = math.log(2.0 * math.pi)
    log_det = jnp.sum(jnp.log(var))
    d = (action - mean) * rstd
    maha = jnp.sum(d * d, axis=-1)
    logp = -0.5 * (k * log2pi + log_det) - 0.5 * maha
    ent = 0.5 * k * (1.0 + log2pi) + 0.5 * log_det
    return logp, value[:, 0], jnp.full((state.shape[0],), ent, jnp.float32)


if __name__ == "__main__":
    STATE_DIM, ACTION_DIM, ACTION_STD = 8, 4, 0.5

    key = jax.random.PRNGKey(0)
    kp, ks, ka, ks2, ka2 = jax.random.split(key, 5)

    params = init_params(kp, STATE_DIM, ACTION_DIM)
    packed = pack_params(params)
    action_var = jnp.full((1, ACTION_DIM), ACTION_STD * ACTION_STD, jnp.float32)
    tanh_bf16 = _tanh_bf16_default()

    # --- small batch (single tile) ---
    B = 8
    state = jax.random.normal(ks, (B, STATE_DIM), jnp.float32)
    action = jax.random.normal(ka, (B, ACTION_DIM), jnp.float32)
    logp, value, ent = evaluate(state, action, action_var, packed)
    jax.block_until_ready((logp, value, ent))
    logp_r, value_r, ent_r = evaluate_ref(state, action, action_var, params,
                                          tanh_bf16=tanh_bf16)
    assert jnp.allclose(logp, logp_r, atol=2e-2, rtol=2e-3)
    assert jnp.allclose(value, value_r, atol=2e-2, rtol=2e-3)
    assert jnp.allclose(ent, ent_r, atol=1e-5, rtol=1e-5)

    # --- larger batch exercising the batch grid (padding + 3 tiles of 128) ---
    B2 = 300
    state2 = jax.random.normal(ks2, (B2, STATE_DIM), jnp.float32)
    action2 = jax.random.normal(ka2, (B2, ACTION_DIM), jnp.float32)
    logp2, value2, ent2 = evaluate(state2, action2, action_var, packed, tile_b=128)
    jax.block_until_ready((logp2, value2, ent2))
    logp2_r, value2_r, ent2_r = evaluate_ref(state2, action2, action_var, params,
                                             tanh_bf16=tanh_bf16)
    assert jnp.allclose(logp2, logp2_r, atol=2e-2, rtol=2e-3)
    assert jnp.allclose(value2, value2_r, atol=2e-2, rtol=2e-3)
    assert jnp.allclose(ent2, ent2_r, atol=1e-5, rtol=1e-5)

    # --- default (generation-aware) tiling path ---
    logp3, value3, ent3 = evaluate(state2, action2, action_var, packed)
    jax.block_until_ready((logp3, value3, ent3))
    assert jnp.allclose(logp3, logp2_r, atol=2e-2, rtol=2e-3)
    assert jnp.allclose(value3, value2_r, atol=2e-2, rtol=2e-3)

    print("KERNEL_OK")
</pallas_src>

<mosaic_0001>
module attributes {stable_mosaic.version = 11 : i64} {
  func.func @_actor_critic_kernel(%arg0: i32, %arg1: memref<8x12xf32, #tpu.memory_space<vmem>>, %arg2: memref<1x4xf32, #tpu.memory_space<vmem>>, %arg3: memref<1xf32, #tpu.memory_space<smem>>, %arg4: memref<8x256xbf16, #tpu.memory_space<vmem>>, %arg5: memref<1x256xf32, #tpu.memory_space<vmem>>, %arg6: memref<256x128xbf16, #tpu.memory_space<vmem>>, %arg7: memref<1x128xf32, #tpu.memory_space<vmem>>, %arg8: memref<128x64xbf16, #tpu.memory_space<vmem>>, %arg9: memref<1x64xf32, #tpu.memory_space<vmem>>, %arg10: memref<64x5xbf16, #tpu.memory_space<vmem>>, %arg11: memref<1x5xf32, #tpu.memory_space<vmem>>, %arg12: memref<8x2xf32, #tpu.memory_space<vmem>>) attributes {dimension_semantics = [#tpu.dimension_semantics<parallel>], iteration_bounds = array<i64: 1>, scalar_prefetch = 0 : i64, scratch_operands = 0 : i64, tpu.core_type = #tpu.core_type<tc>, window_params = [{transform_indices = @transform_0, window_bounds = array<i64: 8, 12>}, {pipeline_mode = #tpu.pipeline_mode<synchronous>, transform_indices = @transform_1, window_bounds = array<i64: 1, 4>}, {transform_indices = @transform_2, window_bounds = array<i64: 1>}, {pipeline_mode = #tpu.pipeline_mode<synchronous>, transform_indices = @transform_3, window_bounds = array<i64: 8, 256>}, {pipeline_mode = #tpu.pipeline_mode<synchronous>, transform_indices = @transform_4, window_bounds = array<i64: 1, 256>}, {pipeline_mode = #tpu.pipeline_mode<synchronous>, transform_indices = @transform_5, window_bounds = array<i64: 256, 128>}, {pipeline_mode = #tpu.pipeline_mode<synchronous>, transform_indices = @transform_6, window_bounds = array<i64: 1, 128>}, {pipeline_mode = #tpu.pipeline_mode<synchronous>, transform_indices = @transform_7, window_bounds = array<i64: 128, 64>}, {pipeline_mode = #tpu.pipeline_mode<synchronous>, transform_indices = @transform_8, window_bounds = array<i64: 1, 64>}, {pipeline_mode = #tpu.pipeline_mode<synchronous>, transform_indices = @transform_9, window_bounds = array<i64: 64, 5>}, {pipeline_mode = #tpu.pipeline_mode<synchronous>, transform_indices = @transform_10, window_bounds = array<i64: 1, 5>}, {transform_indices = @transform_11, window_bounds = array<i64: 8, 2>}]} {
    %c0 = arith.constant 0 : index
    %c0_0 = arith.constant 0 : index
    %0 = vector.load %arg1[%c0, %c0_0] : memref<8x12xf32, #tpu.memory_space<vmem>>, vector<8x12xf32>
    %1 = vector.extract_strided_slice %0 {offsets = [0, 0], sizes = [8, 8], strides = [1, 1]} : vector<8x12xf32> to vector<8x8xf32>
    %2 = vector.extract_strided_slice %0 {offsets = [0, 8], sizes = [8, 4], strides = [1, 1]} : vector<8x12xf32> to vector<8x4xf32>
    %c0_1 = arith.constant 0 : index
    %c0_2 = arith.constant 0 : index
    %3 = vector.load %arg2[%c0_1, %c0_2] : memref<1x4xf32, #tpu.memory_space<vmem>>, vector<1x4xf32>
    %c0_3 = arith.constant 0 : index
    %4 = memref.load %arg3[%c0_3] : memref<1xf32, #tpu.memory_space<smem>>
    %5 = arith.truncf %1 : vector<8x8xf32> to vector<8x8xbf16>
    %c0_4 = arith.constant 0 : index
    %c0_5 = arith.constant 0 : index
    %6 = vector.load %arg4[%c0_4, %c0_5] : memref<8x256xbf16, #tpu.memory_space<vmem>>, vector<8x256xbf16>
    %cst = arith.constant dense<0.000000e+00> : vector<8x256xf32>
    %7 = tpu.matmul %5, %6, %cst {dimension_numbers = #tpu.dot_dimension_numbers<[1], [0], [0], [1], [0, 0, 1, 1], [], []>} : vector<8x8xbf16>, vector<8x256xbf16>, vector<8x256xf32> -> vector<8x256xf32>
    %c0_6 = arith.constant 0 : index
    %c0_7 = arith.constant 0 : index
    %8 = vector.load %arg5[%c0_6, %c0_7] : memref<1x256xf32, #tpu.memory_space<vmem>>, vector<1x256xf32>
    %9 = vector.broadcast %8 : vector<1x256xf32> to vector<8x256xf32>
    %10 = arith.addf %7, %9 : vector<8x256xf32>
    %11 = math.tanh %10 : vector<8x256xf32>
    %12 = arith.truncf %11 : vector<8x256xf32> to vector<8x256xbf16>
    %c0_8 = arith.constant 0 : index
    %c0_9 = arith.constant 0 : index
    %13 = vector.load %arg6[%c0_8, %c0_9] : memref<256x128xbf16, #tpu.memory_space<vmem>>, vector<256x128xbf16>
    %cst_10 = arith.constant dense<0.000000e+00> : vector<8x128xf32>
    %14 = tpu.matmul %12, %13, %cst_10 {dimension_numbers = #tpu.dot_dimension_numbers<[1], [0], [0], [1], [0, 0, 1, 1], [], []>} : vector<8x256xbf16>, vector<256x128xbf16>, vector<8x128xf32> -> vector<8x128xf32>
    %c0_11 = arith.constant 0 : index
    %c0_12 = arith.constant 0 : index
    %15 = vector.load %arg7[%c0_11, %c0_12] : memref<1x128xf32, #tpu.memory_space<vmem>>, vector<1x128xf32>
    %16 = vector.broadcast %15 : vector<1x128xf32> to vector<8x128xf32>
    %17 = arith.addf %14, %16 : vector<8x128xf32>
    %18 = math.tanh %17 : vector<8x128xf32>
    %19 = arith.truncf %18 : vector<8x128xf32> to vector<8x128xbf16>
    %c0_13 = arith.constant 0 : index
    %c0_14 = arith.constant 0 : index
    %20 = vector.load %arg8[%c0_13, %c0_14] : memref<128x64xbf16, #tpu.memory_space<vmem>>, vector<128x64xbf16>
    %cst_15 = arith.constant dense<0.000000e+00> : vector<8x64xf32>
    %21 = tpu.matmul %19, %20, %cst_15 {dimension_numbers = #tpu.dot_dimension_numbers<[1], [0], [0], [1], [0, 0, 1, 1], [], []>} : vector<8x128xbf16>, vector<128x64xbf16>, vector<8x64xf32> -> vector<8x64xf32>
    %c0_16 = arith.constant 0 : index
    %c0_17 = arith.constant 0 : index
    %22 = vector.load %arg9[%c0_16, %c0_17] : memref<1x64xf32, #tpu.memory_space<vmem>>, vector<1x64xf32>
    %23 = vector.broadcast %22 : vector<1x64xf32> to vector<8x64xf32>
    %24 = arith.addf %21, %23 : vector<8x64xf32>
    %25 = math.tanh %24 : vector<8x64xf32>
    %26 = arith.truncf %25 : vector<8x64xf32> to vector<8x64xbf16>
    %c0_18 = arith.constant 0 : index
    %c0_19 = arith.constant 0 : index
    %27 = vector.load %arg10[%c0_18, %c0_19] : memref<64x5xbf16, #tpu.memory_space<vmem>>, vector<64x5xbf16>
    %cst_20 = arith.constant dense<0.000000e+00> : vector<8x5xf32>
    %28 = tpu.matmul %26, %27, %cst_20 {dimension_numbers = #tpu.dot_dimension_numbers<[1], [0], [0], [1], [0, 0, 1, 1], [], []>} : vector<8x64xbf16>, vector<64x5xbf16>, vector<8x5xf32> -> vector<8x5xf32>
    %c0_21 = arith.constant 0 : index
    %c0_22 = arith.constant 0 : index
    %29 = vector.load %arg11[%c0_21, %c0_22] : memref<1x5xf32, #tpu.memory_space<vmem>>, vector<1x5xf32>
    %30 = vector.broadcast %29 : vector<1x5xf32> to vector<8x5xf32>
    %31 = arith.addf %28, %30 : vector<8x5xf32>
    %32 = vector.extract_strided_slice %31 {offsets = [0, 0], sizes = [8, 4], strides = [1, 1]} : vector<8x5xf32> to vector<8x4xf32>
    %33 = math.tanh %32 : vector<8x4xf32>
    %34 = vector.extract_strided_slice %31 {offsets = [0, 4], sizes = [8, 1], strides = [1, 1]} : vector<8x5xf32> to vector<8x1xf32>
    %35 = arith.subf %2, %33 : vector<8x4xf32>
    %36 = vector.broadcast %3 : vector<1x4xf32> to vector<8x4xf32>
    %37 = arith.mulf %35, %36 : vector<8x4xf32>
    %38 = arith.mulf %37, %37 : vector<8x4xf32>
    %cst_23 = arith.constant dense<0.000000e+00> : vector<8xf32>
    %39 = vector.multi_reduction <add>, %38, %cst_23 [1] : vector<8x4xf32> to vector<8xf32>
    %40 = vector.shape_cast %39 : vector<8xf32> to vector<8x1xf32>
    %cst_24 = arith.constant 5.000000e-01 : f32
    %41 = vector.broadcast %cst_24 : f32 to vector<8x1xf32>
    %42 = arith.mulf %41, %40 : vector<8x1xf32>
    %43 = vector.broadcast %4 : f32 to vector<8x1xf32>
    %44 = arith.subf %43, %42 : vector<8x1xf32>
    %45 = tpu.concatenate %44, %34 in 1 : vector<8x1xf32>, vector<8x1xf32> -> vector<8x2xf32>
    %c0_25 = arith.constant 0 : index
    %c0_26 = arith.constant 0 : index
    %46 = vector.load %arg12[%c0_25, %c0_26] : memref<8x2xf32, #tpu.memory_space<vmem>>, vector<8x2xf32>
    tpu.vector_store %arg12[%c0_25, %c0_26], %45 {strides = array<i32>} : memref<8x2xf32, #tpu.memory_space<vmem>>, vector<8x2xf32>,
    return
  }
  func.func @transform_0(%arg0: i32) -> (i32, i32) {
    %c0_i32 = arith.constant 0 : i32
    %c0_i32_0 = arith.constant 0 : i32
    return %arg0, %c0_i32 : i32, i32
  }
  func.func @transform_1(%arg0: i32) -> (i32, i32) {
    %c0_i32 = arith.constant 0 : i32
    %c0_i32_0 = arith.constant 0 : i32
    %c0_i32_1 = arith.constant 0 : i32
    return %c0_i32, %c0_i32_0 : i32, i32
  }
  func.func @transform_2(%arg0: i32) -> i32 {
    %c0_i32 = arith.constant 0 : i32
    %c0_i32_0 = arith.constant 0 : i32
    return %c0_i32 : i32
  }
  func.func @transform_3(%arg0: i32) -> (i32, i32) {
    %c0_i32 = arith.constant 0 : i32
    %c0_i32_0 = arith.constant 0 : i32
    %c0_i32_1 = arith.constant 0 : i32
    return %c0_i32, %c0_i32_0 : i32, i32
  }
  func.func @transform_4(%arg0: i32) -> (i32, i32) {
    %c0_i32 = arith.constant 0 : i32
    %c0_i32_0 = arith.constant 0 : i32
    %c0_i32_1 = arith.constant 0 : i32
    return %c0_i32, %c0_i32_0 : i32, i32
  }
  func.func @transform_5(%arg0: i32) -> (i32, i32) {
    %c0_i32 = arith.constant 0 : i32
    %c0_i32_0 = arith.constant 0 : i32
    %c0_i32_1 = arith.constant 0 : i32
    return %c0_i32, %c0_i32_0 : i32, i32
  }
  func.func @transform_6(%arg0: i32) -> (i32, i32) {
    %c0_i32 = arith.constant 0 : i32
    %c0_i32_0 = arith.constant 0 : i32
    %c0_i32_1 = arith.constant 0 : i32
    return %c0_i32, %c0_i32_0 : i32, i32
  }
  func.func @transform_7(%arg0: i32) -> (i32, i32) {
    %c0_i32 = arith.constant 0 : i32
    %c0_i32_0 = arith.constant 0 : i32
    %c0_i32_1 = arith.constant 0 : i32
    return %c0_i32, %c0_i32_0 : i32, i32
  }
  func.func @transform_8(%arg0: i32) -> (i32, i32) {
    %c0_i32 = arith.constant 0 : i32
    %c0_i32_0 = arith.constant 0 : i32
    %c0_i32_1 = arith.constant 0 : i32
    return %c0_i32, %c0_i32_0 : i32, i32
  }
  func.func @transform_9(%arg0: i32) -> (i32, i32) {
    %c0_i32 = arith.constant 0 : i32
    %c0_i32_0 = arith.constant 0 : i32
    %c0_i32_1 = arith.constant 0 : i32
    return %c0_i32, %c0_i32_0 : i32, i32
  }
  func.func @transform_10(%arg0: i32) -> (i32, i32) {
    %c0_i32 = arith.constant 0 : i32
    %c0_i32_0 = arith.constant 0 : i32
    %c0_i32_1 = arith.constant 0 : i32
    return %c0_i32, %c0_i32_0 : i32, i32
  }
  func.func @transform_11(%arg0: i32) -> (i32, i32) {
    %c0_i32 = arith.constant 0 : i32
    %c0_i32_0 = arith.constant 0 : i32
    return %arg0, %c0_i32 : i32, i32
  }
}

</mosaic_0001>

<bundles_post_ra>
// kernel: evaluate.1
= control target key start
LH: loop header
LB: loop body
LE: loop exit
PB: predicated region body
PF: predicated region fallthrough
CT: control target
= control target key end

     0   :  { %17 = vsyncpa [#allocation4], 0  ;;  %s635_s20 = smov [#allocation3]   ;;  %s636_s22 = smov 64   ;;  %s772_s0 = inlined_call_operand.vmem [shape: f32[8,12], index: 0, kind: input, shape index: {}]   ;;  %s773_s1 = inlined_call_operand.vmem [shape: f32[1,4], index: 1, kind: input, shape index: {}]   ;;  %s774_s2 = inlined_call_operand.<no memory space> [shape: f32[1], index: 2, kind: input, shape index: {}]   ;;  %s775_s3 = inlined_call_operand.vmem [shape: bf16[8,256], index: 3, kind: input, shape index: {}]   ;;  %s776_s4 = inlined_call_operand.vmem [shape: f32[1,256], index: 4, kind: input, shape index: {}]   ;;  %s777_s5 = inlined_call_operand.hbm [shape: bf16[256,128], index: 5, kind: input, shape index: {}]   ;;  %s778_s6 = inlined_call_operand.vmem [shape: f32[1,128], index: 6, kind: input, shape index: {}]   ;;  %s779_s7 = inlined_call_operand.vmem [shape: bf16[128,64], index: 7, kind: input, shape index: {}]   ;;  %s780_s8 = inlined_call_operand.vmem [shape: f32[1,64], index: 8, kind: input, shape index: {}]   ;;  %s781_s9 = inlined_call_operand.vmem [shape: bf16[64,5], index: 9, kind: input, shape index: {}]   ;;  %s782_s10 = inlined_call_operand.vmem [shape: f32[1,5], index: 10, kind: input, shape index: {}]   ;;  %s783_s11 = inlined_call_operand.vmem [shape: f32[8,2], index: 11, kind: output, shape index: {}]  }
   0x1   :  { %s32_s19 = sshll.u32 %s777_s5, 4  ;;  %s34_s21 = sshll.u32 %s635_s20, 4  ;;  %s33_s19 = int_to_ptr.hbm [resolvable:$true] %s32_s19  ;;  %s35_s21 = int_to_ptr.vmem [resolvable:$true] %s34_s21 }
   0x2   :  { %s637_s23 = smov 4  }
   0x3   :  { %40 = dma.hbm_to_vmem [thread:$0]  %s33_s19, 2048, %s35_s21, [#allocation4], %s636_s22, %s636_s22, %s637_s23  }
   0x4   :  { %633 = dma.done.wait [#allocation4], 2048  }
   0x5   :  { %634 = vsyncadd [#allocation4], 4294965248  ;;  %v60_v0 = vld [vmem:[%s775_s3] sm:$0xff]  ;;  %v568_v1 = vld [vmem:[#allocation3 + $0x38] sm:$0xff]  ;;  %vm76_vm0 = vcmask 1043456   ;;  %vm72_vm1 = vcmask 64512  }
   0x6   :  { %v68_v2 = vunpack.c.l.b16 %v60_v0  ;;  %v69_v3 = vunpack.c.h.b16 %v60_v0  ;;  %v576_v4 = vld [vmem:[#allocation3 + $0x78] sm:$0xff]  ;;  %v710_v5 = vld [vmem:[%s772_s0] sm:$0xff]  ;;  %245 = vmatpush.bf16.msra.mxu2 %v568_v1  ;;  %v567_v8 = vld [vmem:[#allocation3 + $0x30] sm:$0xff]  ;;  %vm392_vm2 = vcmask 523264   ;;  %vm426_vm3 = vcmask 31744  }
   0x7   :  { %258 = vmatpush.bf16.msra.mxu3 %v576_v4  ;;  %v575_v9 = vld [vmem:[#allocation3 + $0x70] sm:$0xff]  ;;  %v59_v12 = vpack.c.bf16 %v710_v5, %v710_v5  ;;  %v566_v13 = vld [vmem:[#allocation3 + $0x28] sm:$0xff]  ;;  %v565_v15 = vld [vmem:[#allocation3 + $0x20] sm:$0xff]  ;;  %vm437_vm4 = vcmask 7168   ;;  %vm439_vm5 = vcmask 15360  }
   0x8   :  { %v70_v6 = vpack.c.b16 %v68_v2, %v68_v2  ;;  %v71_v7 = vpack.c.b16 %v69_v3, %v69_v3  ;;  %v574_v14 = vld [vmem:[#allocation3 + $0x68] sm:$0xff]  ;;  %v573_v16 = vld [vmem:[#allocation3 + $0x60] sm:$0xff]  ;;  %v564_v17 = vld [vmem:[#allocation3 + $0x18] sm:$0xff] }
   0x9   :  { %v572_v18 = vld [vmem:[#allocation3 + $0x58] sm:$0xff]  ;;  %v563_v19 = vld [vmem:[#allocation3 + $0x10] sm:$0xff]  ;;  %v562_v21 = vld [vmem:[#allocation3 + $0x8] sm:$0xff] }
   0xa   :  { %v78_v10 = vsel %vm76_vm0, %v70_v6, 0  ;;  %v81_v11 = vsel %vm76_vm0, %v71_v7, 0  ;;  %246 = vmatpush.bf16.msra.mxu2 %v567_v8  ;;  %v571_v20 = vld [vmem:[#allocation3 + $0x50] sm:$0xff]  ;;  %v570_v22 = vld [vmem:[#allocation3 + $0x48] sm:$0xff]  ;;  %v561_v23 = vld [vmem:[#allocation3] sm:$0xff] }
   0xb   :  { %90 = vmatpush.bf16.msra.mxu0 %v78_v10  ;;  %103 = vmatpush.bf16.msra.mxu1 %v81_v11  ;;  %v569_v24 = vld [vmem:[#allocation3 + $0x40] sm:$0xff]  ;;  %v584_v25 = vld [vmem:[%s779_s7 + $0x38] sm:$0xff]  ;;  %v583_v26 = vld [vmem:[%s779_s7 + $0x30] sm:$0xff] }
   0xc   :  { %259 = vmatpush.bf16.msra.mxu3 %v575_v9  ;;  %v582_v27 = vld [vmem:[%s779_s7 + $0x28] sm:$0xff]  ;;  %v581_v28 = vld [vmem:[%s779_s7 + $0x20] sm:$0xff]  ;;  %v580_v30 = vld [vmem:[%s779_s7 + $0x18] sm:$0xff] }
   0xd   :  { %v61_v29 = vld [vmem:[%s776_s4] sm:$0x3]  ;;  %v579_v43 = vld [vmem:[%s779_s7 + $0x10] sm:$0xff]  ;;  %v578_v44 = vld [vmem:[%s779_s7 + $0x8] sm:$0xff] }
   0xe   :  { %446 = vmatmul.msk.bf16.vlgmr.msra.gmra.mxu0 %vm72_vm1, %v59_v12  ;;  %447 = vmatmul.msk.bf16.vlgmr.msra.gmra.mxu1 %vm72_vm1, %v59_v12  ;;  %v63_v31 = vperm.slane %v61_v29, 0  ;;  %v64_v32 = vperm.slane %v61_v29, 1  ;;  %v577_v45 = vld [vmem:[%s779_s7] sm:$0xff]  ;;  %v588_v46 = vld [vmem:[%s781_s9 + $0x18] sm:$0xff]  ;;  %v587_v56 = vld [vmem:[%s781_s9 + $0x10] sm:$0xff] }
   0xf   :  { %247 = vmatpush.bf16.msra.mxu2 %v566_v13  ;;  %341 = vmatpush.bf16.msrb.mxu0 %v584_v25  ;;  %v595_v47 = vld [vmem:[%s778_s6] ss:$0 sm:$0xff]  ;;  %v586_v57 = vld [vmem:[%s781_s9 + $0x8] sm:$0xff] }
  0x10   :  { %260 = vmatpush.bf16.msra.mxu3 %v574_v14  ;;  %400 = vmatpush.bf16.msrb.mxu1 %v588_v46  ;;  %v585_v58 = vld [vmem:[%s781_s9] sm:$0xff]  ;;  %s638_s9 = smov 125  }
  0x11   :  { %v596_v59 = vld [vmem:[%s780_s8] ss:$0 sm:$0xff]  ;;  %s639_s8 = smov 8  }
  0x12   :  { %v597_v1 = vld [vmem:[%s782_s10] ss:$0 sm:$0xff]  ;;  %s640_s10 = smov 120  }
  0x13   :  { %248 = vmatpush.bf16.msra.mxu2 %v565_v15  ;;  %342 = vmatpush.bf16.msrb.mxu0 %v583_v26  ;;  %v598_v7 = vld [vmem:[%s773_s1] ss:$0 sm:$0xff]  ;;  %v431_v15 = vstv %s774_s2 }
  0x14   :  { %261 = vmatpush.bf16.msra.mxu3 %v573_v16  ;;  %401 = vmatpush.bf16.msrb.mxu1 %v587_v56 }
  0x17   :  { %249 = vmatpush.bf16.msra.mxu2 %v564_v17  ;;  %343 = vmatpush.bf16.msrb.mxu0 %v582_v27 }
  0x18   :  { %262 = vmatpush.bf16.msra.mxu3 %v572_v18  ;;  %402 = vmatpush.bf16.msrb.mxu1 %v586_v57 }
  0x1b   :  { %250 = vmatpush.bf16.msra.mxu2 %v563_v19  ;;  %344 = vmatpush.bf16.msrb.mxu0 %v581_v28 }
  0x1c   :  { %263 = vmatpush.bf16.msra.mxu3 %v571_v20  ;;  %403 = vmatpush.bf16.msrb.mxu1 %v585_v58 }
  0x1f   :  { %251 = vmatpush.bf16.msra.mxu2 %v562_v21  ;;  %345 = vmatpush.bf16.msrb.mxu0 %v580_v30 }
  0x20   :  { %264 = vmatpush.bf16.msra.mxu3 %v570_v22 }
  0x23   :  { %252 = vmatpush.bf16.msra.mxu2 %v561_v23  ;;  %346 = vmatpush.bf16.msrb.mxu0 %v579_v43 }
  0x24   :  { %265 = vmatpush.bf16.msra.mxu3 %v569_v24 }
  0x27   :  { %347 = vmatpush.bf16.msrb.mxu0 %v578_v44 }
  0x2b   :  { %348 = vmatpush.bf16.msrb.mxu0 %v577_v45 }
  0x8b   :  { %v92_v33 = vpop.f32.mrf.mxu0  ;;  %v105_v34 = vpop.f32.mrf.mxu1 }
  0x8c   :  { %v93_v35 = vadd.f32 %v92_v33, %v63_v31  ;;  %v106_v36 = vadd.f32 %v105_v34, %v64_v32 }
  0x8e   :  { %599 = vtanh.f32 %v93_v35 }
  0x8f   :  { %601 = vtanh.f32 %v106_v36 }
  0x93   :  { %v94_v37 = vpop.f32.mrf.mxu0  ;;  %v107_v38 = vpop.f32.mrf.mxu1 }
  0x94   :  { %v600_v39 = vpop.eup %599 }
  0x95   :  { %v602_v40 = vpop.eup %601  ;;  %v111_v41 = vpack.c.bf16 %v600_v39, %v600_v39 }
  0x96   :  { %v112_v42 = vpack.c.bf16 %v602_v40, %v602_v40 }
  0x97   :  { %253 = vmatmul.bf16.vlgmr.msra.gmra.mxu2 %v111_v41 }
  0x98   :  { %266 = vmatmul.bf16.vlgmr.msra.gmra.mxu3 %v112_v42 }
 0x11a   :  { %v254_v48 = vpop.f32.mrf.mxu2 }
 0x11b   :  { %v255_v49 = vadd.f32 %v595_v47, %v254_v48  ;;  %v267_v50 = vpop.f32.mrf.mxu3 }
 0x11d   :  { %v268_v51 = vadd.f32 %v267_v50, %v255_v49 }
 0x11f   :  { %603 = vtanh.f32 %v268_v51 }
 0x122   :  { %v256_v52 = vpop.f32.mrf.mxu2 }
 0x123   :  { %v269_v53 = vpop.f32.mrf.mxu3 }
 0x125   :  { %v604_v54 = vpop.eup %603 }
 0x126   :  { %v272_v55 = vpack.c.bf16 %v604_v54, %v604_v54 }
 0x128   :  { %349 = vmatmul.bf16.vlgmr.msrb.gmra.mxu0 %v272_v55 }
 0x1a5   :  { %v350_v60 = vpop.f32.mrf.mxu0 }
 0x1a6   :  { %v351_v61 = vadd.f32 %v596_v59, %v350_v60 }
 0x1a8   :  { %605 = vtanh.f32 %v351_v61 }
 0x1ad   :  { %v352_v62 = vpop.f32.mrf.mxu0 }
 0x1ae   :  { %v606_v63 = vpop.eup %605 }
 0x1af   :  { %v355_v0 = vpack.c.bf16 %v606_v63, %v606_v63 }
 0x1b1   :  { %560 = vmatmul.msk.bf16.vlgmr.msrb.gmra.mxu1 %vm392_vm2, %v355_v0 }
 0x22e   :  { %v405_v2 = vpop.f32.mrf.mxu1 }
 0x22f   :  { %v406_v3 = vadd.f32 %v597_v1, %v405_v2 }
 0x231   :  { %607 = vtanh.f32 %v406_v3  ;;  %434 = vrot.lane.b32.xlu2 %v406_v3, %s638_s9 }
 0x236   :  { %v407_v4 = vpop.f32.mrf.mxu1 }
 0x237   :  { %v608_v6 = vpop.eup %607 }
 0x238   :  { %411 = vrot.lane.b32.xlu0 %v608_v6, %s639_s8 }
 0x240   :  { %417 = vrot.lane.b32.xlu0 %v598_v7, %s639_s8 }
 0x28b   :  { %v435_v19 = vpop.permute.xlu2 %434 }
 0x2aa   :  { %v412_v8 = vpop.permute.xlu0 %411 }
 0x2ab   :  { %v414_v9 = vsub.f32 %v710_v5, %v412_v8 }
 0x2b2   :  { %v418_v10 = vpop.permute.xlu0 %417 }
 0x2b3   :  { %v420_v11 = vmul.f32 %v418_v10, %v414_v9 }
 0x2b5   :  { %v421_v12 = vmul.f32 %v420_v11, %v420_v11 }
 0x2b7   :  { %423 = vrot.lane.b32.xlu1 %v421_v12, %s640_s10 }
 0x329   :  { %v424_v13 = vpop.permute.xlu1 %423 }
 0x32a   :  { %v427_v14 = vsel %vm426_vm3, %v424_v13, 0.0 }
 0x32b   :  { %428 = vadd.xlane.f32.xlu1 %v427_v14 }
 0x39e   :  { %v429_v16 = vpop.xlane.xlu1 %428 }
 0x39f   :  { %v430_v17 = vmul.f32 0.5, %v429_v16 }
 0x3a1   :  { %v432_v18 = vsub.f32 %v431_v15, %v430_v17 }
 0x3a3   :  { %v438_v5 = vsel %vm437_vm4, %v432_v18, %v435_v19 }
 0x3a4   :  { %440 = vst.msk [vmem:[%s783_s11] sm:$0xff] %vm439_vm5, %v438_v5 }
 0x3a5   :  { %445 = vsyncpa [#allocation4], 1 }

</bundles_post_ra>
